<compile_context>
chip_gen: v7x
topology: tpu7x:2x2x1
jax: 0.10.0
libtpu: 0.0.40
codegen_flags: <defaults>
</compile_context>

<pallas_src>
import jax
import jax.numpy as jnp
from jax.experimental import pallas as pl
from jax.experimental.pallas import tpu as pltpu


_HALO = 8  # aligned halo rows on each side of the VMEM row buffer (only 1 is read)


# ----------------------------- Pallas kernel -------------------------------

def _conv_bn_relu_band(buf_ref, a_ref, s_ref, b_ref, H):
    """3x3 'SAME' conv + folded-BN + ReLU from an H-padded row buffer.

    buf_ref : (H + 2*_HALO, W*Cin) VMEM; image rows at [_HALO:_HALO+H], the
              rows just outside that range are zero (the 1-row H halo).
    a_ref   : (3, W*Cin, W*Cout) band weights (W taps + channel contraction
              folded into one matrix per ky tap; W padding is built in).
    s_ref   : (1, W*Cout) folded-BN scale, tiled across W.
    b_ref   : (1, W*Cout) folded-BN bias,  tiled across W.
    returns : (H, W*Cout) float32
    """
    n_out = a_ref.shape[2]
    acc = jnp.zeros((H, n_out), jnp.float32)
    for ky in range(3):                      # static unroll -> 3 MXU matmuls
        lhs = buf_ref[_HALO - 1 + ky:_HALO - 1 + ky + H, :]
        acc = acc + jnp.dot(lhs, a_ref[ky],
                            preferred_element_type=jnp.float32)
    return jnp.maximum(acc * s_ref[...] + b_ref[...], 0.0)


def block_type_b_kernel(x_ref, a1_ref, s1_ref, b1_ref, a2_ref, s2_ref, b2_ref,
                        out_ref, xbuf_ref, ybuf_ref):
    H = x_ref.shape[1]
    wc_in = x_ref.shape[2]
    zeros_halo = jnp.zeros((_HALO, wc_in), jnp.float32)

    # Stage x into the H-padded row buffer (aligned writes only).
    xbuf_ref[0:_HALO, :] = zeros_halo
    xbuf_ref[_HALO + H:_HALO + H + _HALO, :] = zeros_halo
    xbuf_ref[_HALO:_HALO + H, :] = x_ref[0]

    # conv1 + BN1 + ReLU + residual — intermediate never leaves VMEM.
    y1 = _conv_bn_relu_band(xbuf_ref, a1_ref, s1_ref, b1_ref, H) + x_ref[0]

    ybuf_ref[0:_HALO, :] = zeros_halo
    ybuf_ref[_HALO + H:_HALO + H + _HALO, :] = zeros_halo
    ybuf_ref[_HALO:_HALO + H, :] = y1

    # conv2 + BN2 + ReLU -> lane-dense (H, W*Cout) output slab.
    out_ref[0] = _conv_bn_relu_band(ybuf_ref, a2_ref, s2_ref, b2_ref, H)


# ------------------------------ JAX wrapper --------------------------------

def _fold_bn(gamma, beta, mean, var, conv_bias, eps=1e-5):
    scale = gamma / jnp.sqrt(var + eps)
    bias = beta + (conv_bias - mean) * scale
    return scale, bias


def _band_weights(w_hwio, W):
    """Fold W-direction taps + channel contraction into per-ky band matrices.

    w_hwio: (3, 3, Cin, Cout) -> A: (3, W*Cin, W*Cout) with
    A[ky, w'*Cin+ci, w*Cout+co] = w_hwio[ky, kx, ci, co] where w' = w + kx - 1;
    out-of-range w' entries are zero => implements the W-direction padding.
    """
    kH, kW, Cin, Cout = w_hwio.shape
    A = jnp.zeros((kH, W * Cin, W * Cout), jnp.float32)
    eye = jnp.eye(W, dtype=jnp.float32)
    for kx in range(kW):
        shift = kx - 1
        S = jnp.roll(eye, shift, axis=0)        # S[w', w] = 1 iff w' == w + shift
        if shift > 0:
            S = S.at[:shift, :].set(0.0)        # drop wrapped rows (padding)
        elif shift < 0:
            S = S.at[shift:, :].set(0.0)
        A = A + jnp.einsum("uw,kio->kuiwo", S, w_hwio[:, kx]).reshape(
            kH, W * Cin, W * Cout)
    return A


@jax.jit
def block_type_b_forward(x_nchw, params):
    """BlockTypeB.forward: x = relu(bn1(conv1(x))) + x ; x = relu(bn2(conv2(x)))."""
    N, Cin, H, W = x_nchw.shape
    Cout = params["w2"].shape[-1]
    # The residual add requires conv1 to preserve the channel count.
    assert params["w1"].shape[2] == params["w1"].shape[3] == Cin

    # NCHW -> lane-major (N, H, W*Cin) slab (channel fastest within each lane group).
    x_slab = jnp.transpose(x_nchw, (0, 2, 3, 1)).reshape(N, H, W * Cin)

    s1, b1 = _fold_bn(params["g1"], params["be1"], params["m1"], params["v1"],
                      params["b1"])
    s2, b2 = _fold_bn(params["g2"], params["be2"], params["m2"], params["v2"],
                      params["b2"])
    a1 = _band_weights(params["w1"], W)          # (3, W*Cin, W*Cin)
    a2 = _band_weights(params["w2"], W)          # (3, W*Cin, W*Cout)
    s1t = jnp.tile(s1, W)[None, :]               # (1, W*Cin)
    b1t = jnp.tile(b1, W)[None, :]
    s2t = jnp.tile(s2, W)[None, :]               # (1, W*Cout)
    b2t = jnp.tile(b2, W)[None, :]

    # TODO(synk): for large channel counts, cast slabs/band weights to bf16
    # (keeping f32 accumulation) for 2x MXU throughput / 0.5x DMA on v6e/v7x.
    out_slab = pl.pallas_call(
        block_type_b_kernel,
        out_shape=jax.ShapeDtypeStruct((N, H, W * Cout), jnp.float32),
        grid=(N,),
        in_specs=[
            pl.BlockSpec((1, H, W * Cin), lambda n: (n, 0, 0)),
            pl.BlockSpec((3, W * Cin, W * Cin), lambda n: (0, 0, 0)),
            pl.BlockSpec((1, W * Cin), lambda n: (0, 0)),
            pl.BlockSpec((1, W * Cin), lambda n: (0, 0)),
            pl.BlockSpec((3, W * Cin, W * Cout), lambda n: (0, 0, 0)),
            pl.BlockSpec((1, W * Cout), lambda n: (0, 0)),
            pl.BlockSpec((1, W * Cout), lambda n: (0, 0)),
        ],
        out_specs=pl.BlockSpec((1, H, W * Cout), lambda n: (n, 0, 0)),
        scratch_shapes=[
            pltpu.VMEM((H + 2 * _HALO, W * Cin), jnp.float32),
            pltpu.VMEM((H + 2 * _HALO, W * Cin), jnp.float32),
        ],
        compiler_params=pltpu.CompilerParams(
            dimension_semantics=("parallel",)),
    )(x_slab, a1, s1t, b1t, a2, s2t, b2t)

    # (N, H, W*Cout) -> NCHW
    return jnp.transpose(out_slab.reshape(N, H, W, Cout), (0, 3, 1, 2))


# ------------------------------ parameters ---------------------------------

def make_params(key, in_c, out_c):
    """Deterministic synthetic parameters matching BlockTypeB's __init__ shapes."""
    ks = jax.random.split(key, 8)
    p = {}
    # conv1: Conv2d(in_c, in_c, 3, padding=1) -> weights stored HWIO
    p["w1"] = 0.1 * jax.random.normal(ks[0], (3, 3, in_c, in_c), jnp.float32)
    p["b1"] = 0.1 * jax.random.normal(ks[1], (in_c,), jnp.float32)
    # BatchNorm2d(in_c) (eval-mode stats)
    p["g1"] = 1.0 + 0.1 * jax.random.normal(ks[2], (in_c,), jnp.float32)
    p["be1"] = 0.1 * jax.random.normal(ks[3], (in_c,), jnp.float32)
    p["m1"] = 0.05 * jax.random.normal(ks[4], (in_c,), jnp.float32)
    p["v1"] = 1.0 + 0.1 * jnp.abs(jax.random.normal(ks[5], (in_c,), jnp.float32))
    # conv2: Conv2d(in_c, out_c, 3, padding=1)
    p["w2"] = 0.1 * jax.random.normal(ks[6], (3, 3, in_c, out_c), jnp.float32)
    p["b2"] = 0.1 * jax.random.normal(ks[7], (out_c,), jnp.float32)
    # BatchNorm2d(out_c) (eval-mode stats)
    p["g2"] = jnp.ones((out_c,), jnp.float32)
    p["be2"] = jnp.zeros((out_c,), jnp.float32)
    p["m2"] = jnp.zeros((out_c,), jnp.float32)
    p["v2"] = jnp.ones((out_c,), jnp.float32)
    return p


# ------------------------------ reference ----------------------------------

def _ref_forward(x_nchw, params):
    """Pure-JAX reference (lax conv) for correctness checking."""
    def conv_bn_relu(x, w, conv_b, g, be, m, v):
        y = jax.lax.conv_general_dilated(
            x, w, window_strides=(1, 1), padding="SAME",
            dimension_numbers=("NHWC", "HWIO", "NHWC"))
        scale = g / jnp.sqrt(v + 1e-5)
        y = (y + conv_b) * scale + (be - m * scale)
        return jnp.maximum(y, 0.0)

    x = jnp.transpose(x_nchw, (0, 2, 3, 1))
    x = conv_bn_relu(x, params["w1"], params["b1"], params["g1"],
                     params["be1"], params["m1"], params["v1"]) + x
    x = conv_bn_relu(x, params["w2"], params["b2"], params["g2"],
                     params["be2"], params["m2"], params["v2"])
    return jnp.transpose(x, (0, 3, 1, 2))


# --------------------------------- main -------------------------------------

if __name__ == "__main__":
    key = jax.random.PRNGKey(0)
    k_x, k_p = jax.random.split(key)

    N, in_c, out_c, H, W = 2, 4, 8, 16, 16
    x = jax.random.normal(k_x, (N, in_c, H, W), jnp.float32)   # NCHW like PyTorch
    params = make_params(k_p, in_c, out_c)

    out = jax.block_until_ready(block_type_b_forward(x, params))

    ref = _ref_forward(x, params)
    assert out.shape == (N, out_c, H, W), out.shape
    assert jnp.allclose(out, ref, rtol=1e-4, atol=1e-4), \
        float(jnp.max(jnp.abs(out - ref)))

    print("KERNEL_OK")
</pallas_src>

<mosaic_0001>
module attributes {stable_mosaic.version = 11 : i64} {
  func.func @block_type_b_kernel(%arg0: i32, %arg1: memref<1x16x64xf32, #tpu.memory_space<vmem>>, %arg2: memref<3x64x64xf32, #tpu.memory_space<vmem>>, %arg3: memref<1x64xf32, #tpu.memory_space<vmem>>, %arg4: memref<1x64xf32, #tpu.memory_space<vmem>>, %arg5: memref<3x64x128xf32, #tpu.memory_space<vmem>>, %arg6: memref<1x128xf32, #tpu.memory_space<vmem>>, %arg7: memref<1x128xf32, #tpu.memory_space<vmem>>, %arg8: memref<1x16x128xf32, #tpu.memory_space<vmem>>, %arg9: memref<32x64xf32, #tpu.memory_space<vmem>>, %arg10: memref<32x64xf32, #tpu.memory_space<vmem>>) attributes {dimension_semantics = [#tpu.dimension_semantics<parallel>], iteration_bounds = array<i64: 2>, scalar_prefetch = 0 : i64, scratch_operands = 2 : i64, tpu.core_type = #tpu.core_type<tc>, window_params = [{transform_indices = @transform_0, window_bounds = array<i64: 1, 16, 64>}, {pipeline_mode = #tpu.pipeline_mode<synchronous>, transform_indices = @transform_1, window_bounds = array<i64: 3, 64, 64>}, {pipeline_mode = #tpu.pipeline_mode<synchronous>, transform_indices = @transform_2, window_bounds = array<i64: 1, 64>}, {pipeline_mode = #tpu.pipeline_mode<synchronous>, transform_indices = @transform_3, window_bounds = array<i64: 1, 64>}, {pipeline_mode = #tpu.pipeline_mode<synchronous>, transform_indices = @transform_4, window_bounds = array<i64: 3, 64, 128>}, {pipeline_mode = #tpu.pipeline_mode<synchronous>, transform_indices = @transform_5, window_bounds = array<i64: 1, 128>}, {pipeline_mode = #tpu.pipeline_mode<synchronous>, transform_indices = @transform_6, window_bounds = array<i64: 1, 128>}, {transform_indices = @transform_7, window_bounds = array<i64: 1, 16, 128>}]} {
    %cst = arith.constant 0.000000e+00 : f32
    %0 = vector.broadcast %cst : f32 to vector<8x64xf32>
    %c0 = arith.constant 0 : index
    %c0_0 = arith.constant 0 : index
    %1 = vector.load %arg9[%c0, %c0_0] : memref<32x64xf32, #tpu.memory_space<vmem>>, vector<8x64xf32>
    tpu.vector_store %arg9[%c0, %c0_0], %0 {strides = array<i32>} : memref<32x64xf32, #tpu.memory_space<vmem>>, vector<8x64xf32>,
    %c24 = arith.constant 24 : index
    %c0_1 = arith.constant 0 : index
    %2 = vector.load %arg9[%c24, %c0_1] : memref<32x64xf32, #tpu.memory_space<vmem>>, vector<8x64xf32>
    tpu.vector_store %arg9[%c24, %c0_1], %0 {strides = array<i32>} : memref<32x64xf32, #tpu.memory_space<vmem>>, vector<8x64xf32>,
    %c0_2 = arith.constant 0 : index
    %c0_3 = arith.constant 0 : index
    %c0_4 = arith.constant 0 : index
    %3 = vector.load %arg1[%c0_2, %c0_3, %c0_4] : memref<1x16x64xf32, #tpu.memory_space<vmem>>, vector<1x16x64xf32>
    %4 = vector.shape_cast %3 : vector<1x16x64xf32> to vector<16x64xf32>
    %c8 = arith.constant 8 : index
    %c0_5 = arith.constant 0 : index
    %5 = vector.load %arg9[%c8, %c0_5] : memref<32x64xf32, #tpu.memory_space<vmem>>, vector<16x64xf32>
    tpu.vector_store %arg9[%c8, %c0_5], %4 {strides = array<i32>} : memref<32x64xf32, #tpu.memory_space<vmem>>, vector<16x64xf32>,
    %cst_6 = arith.constant 0.000000e+00 : f32
    %6 = vector.broadcast %cst_6 : f32 to vector<16x64xf32>
    %c7 = arith.constant 7 : index
    %c0_7 = arith.constant 0 : index
    %7 = vector.load %arg9[%c7, %c0_7] : memref<32x64xf32, #tpu.memory_space<vmem>>, vector<16x64xf32>
    %c0_8 = arith.constant 0 : index
    %c0_9 = arith.constant 0 : index
    %c0_10 = arith.constant 0 : index
    %8 = vector.load %arg2[%c0_8, %c0_9, %c0_10] : memref<3x64x64xf32, #tpu.memory_space<vmem>>, vector<1x64x64xf32>
    %9 = vector.shape_cast %8 : vector<1x64x64xf32> to vector<64x64xf32>
    %cst_11 = arith.constant dense<0.000000e+00> : vector<16x64xf32>
    %10 = tpu.matmul %7, %9, %cst_11 {dimension_numbers = #tpu.dot_dimension_numbers<[1], [0], [0], [1], [0, 0, 1, 1], [], []>} : vector<16x64xf32>, vector<64x64xf32>, vector<16x64xf32> -> vector<16x64xf32>
    %11 = arith.addf %6, %10 : vector<16x64xf32>
    %c8_12 = arith.constant 8 : index
    %c0_13 = arith.constant 0 : index
    %12 = vector.load %arg9[%c8_12, %c0_13] : memref<32x64xf32, #tpu.memory_space<vmem>>, vector<16x64xf32>
    %c1 = arith.constant 1 : index
    %c0_14 = arith.constant 0 : index
    %c0_15 = arith.constant 0 : index
    %13 = vector.load %arg2[%c1, %c0_14, %c0_15] : memref<3x64x64xf32, #tpu.memory_space<vmem>>, vector<1x64x64xf32>
    %14 = vector.shape_cast %13 : vector<1x64x64xf32> to vector<64x64xf32>
    %cst_16 = arith.constant dense<0.000000e+00> : vector<16x64xf32>
    %15 = tpu.matmul %12, %14, %cst_16 {dimension_numbers = #tpu.dot_dimension_numbers<[1], [0], [0], [1], [0, 0, 1, 1], [], []>} : vector<16x64xf32>, vector<64x64xf32>, vector<16x64xf32> -> vector<16x64xf32>
    %16 = arith.addf %11, %15 : vector<16x64xf32>
    %c9 = arith.constant 9 : index
    %c0_17 = arith.constant 0 : index
    %17 = vector.load %arg9[%c9, %c0_17] : memref<32x64xf32, #tpu.memory_space<vmem>>, vector<16x64xf32>
    %c2 = arith.constant 2 : index
    %c0_18 = arith.constant 0 : index
    %c0_19 = arith.constant 0 : index
    %18 = vector.load %arg2[%c2, %c0_18, %c0_19] : memref<3x64x64xf32, #tpu.memory_space<vmem>>, vector<1x64x64xf32>
    %19 = vector.shape_cast %18 : vector<1x64x64xf32> to vector<64x64xf32>
    %cst_20 = arith.constant dense<0.000000e+00> : vector<16x64xf32>
    %20 = tpu.matmul %17, %19, %cst_20 {dimension_numbers = #tpu.dot_dimension_numbers<[1], [0], [0], [1], [0, 0, 1, 1], [], []>} : vector<16x64xf32>, vector<64x64xf32>, vector<16x64xf32> -> vector<16x64xf32>
    %21 = arith.addf %16, %20 : vector<16x64xf32>
    %c0_21 = arith.constant 0 : index
    %c0_22 = arith.constant 0 : index
    %22 = vector.load %arg3[%c0_21, %c0_22] : memref<1x64xf32, #tpu.memory_space<vmem>>, vector<1x64xf32>
    %23 = vector.broadcast %22 : vector<1x64xf32> to vector<16x64xf32>
    %24 = arith.mulf %21, %23 : vector<16x64xf32>
    %c0_23 = arith.constant 0 : index
    %c0_24 = arith.constant 0 : index
    %25 = vector.load %arg4[%c0_23, %c0_24] : memref<1x64xf32, #tpu.memory_space<vmem>>, vector<1x64xf32>
    %26 = vector.broadcast %25 : vector<1x64xf32> to vector<16x64xf32>
    %27 = arith.addf %24, %26 : vector<16x64xf32>
    %cst_25 = arith.constant 0.000000e+00 : f32
    %28 = vector.broadcast %cst_25 : f32 to vector<16x64xf32>
    %29 = arith.maximumf %27, %28 : vector<16x64xf32>
    %c0_26 = arith.constant 0 : index
    %c0_27 = arith.constant 0 : index
    %c0_28 = arith.constant 0 : index
    %30 = vector.load %arg1[%c0_26, %c0_27, %c0_28] : memref<1x16x64xf32, #tpu.memory_space<vmem>>, vector<1x16x64xf32>
    %31 = vector.shape_cast %30 : vector<1x16x64xf32> to vector<16x64xf32>
    %32 = arith.addf %29, %31 : vector<16x64xf32>
    %c0_29 = arith.constant 0 : index
    %c0_30 = arith.constant 0 : index
    %33 = vector.load %arg10[%c0_29, %c0_30] : memref<32x64xf32, #tpu.memory_space<vmem>>, vector<8x64xf32>
    tpu.vector_store %arg10[%c0_29, %c0_30], %0 {strides = array<i32>} : memref<32x64xf32, #tpu.memory_space<vmem>>, vector<8x64xf32>,
    %c24_31 = arith.constant 24 : index
    %c0_32 = arith.constant 0 : index
    %34 = vector.load %arg10[%c24_31, %c0_32] : memref<32x64xf32, #tpu.memory_space<vmem>>, vector<8x64xf32>
    tpu.vector_store %arg10[%c24_31, %c0_32], %0 {strides = array<i32>} : memref<32x64xf32, #tpu.memory_space<vmem>>, vector<8x64xf32>,
    %c8_33 = arith.constant 8 : index
    %c0_34 = arith.constant 0 : index
    %35 = vector.load %arg10[%c8_33, %c0_34] : memref<32x64xf32, #tpu.memory_space<vmem>>, vector<16x64xf32>
    tpu.vector_store %arg10[%c8_33, %c0_34], %32 {strides = array<i32>} : memref<32x64xf32, #tpu.memory_space<vmem>>, vector<16x64xf32>,
    %cst_35 = arith.constant 0.000000e+00 : f32
    %36 = vector.broadcast %cst_35 : f32 to vector<16x128xf32>
    %c7_36 = arith.constant 7 : index
    %c0_37 = arith.constant 0 : index
    %37 = vector.load %arg10[%c7_36, %c0_37] : memref<32x64xf32, #tpu.memory_space<vmem>>, vector<16x64xf32>
    %c0_38 = arith.constant 0 : index
    %c0_39 = arith.constant 0 : index
    %c0_40 = arith.constant 0 : index
    %38 = vector.load %arg5[%c0_38, %c0_39, %c0_40] : memref<3x64x128xf32, #tpu.memory_space<vmem>>, vector<1x64x128xf32>
    %39 = vector.shape_cast %38 : vector<1x64x128xf32> to vector<64x128xf32>
    %cst_41 = arith.constant dense<0.000000e+00> : vector<16x128xf32>
    %40 = tpu.matmul %37, %39, %cst_41 {dimension_numbers = #tpu.dot_dimension_numbers<[1], [0], [0], [1], [0, 0, 1, 1], [], []>} : vector<16x64xf32>, vector<64x128xf32>, vector<16x128xf32> -> vector<16x128xf32>
    %41 = arith.addf %36, %40 : vector<16x128xf32>
    %c8_42 = arith.constant 8 : index
    %c0_43 = arith.constant 0 : index
    %42 = vector.load %arg10[%c8_42, %c0_43] : memref<32x64xf32, #tpu.memory_space<vmem>>, vector<16x64xf32>
    %c1_44 = arith.constant 1 : index
    %c0_45 = arith.constant 0 : index
    %c0_46 = arith.constant 0 : index
    %43 = vector.load %arg5[%c1_44, %c0_45, %c0_46] : memref<3x64x128xf32, #tpu.memory_space<vmem>>, vector<1x64x128xf32>
    %44 = vector.shape_cast %43 : vector<1x64x128xf32> to vector<64x128xf32>
    %cst_47 = arith.constant dense<0.000000e+00> : vector<16x128xf32>
    %45 = tpu.matmul %42, %44, %cst_47 {dimension_numbers = #tpu.dot_dimension_numbers<[1], [0], [0], [1], [0, 0, 1, 1], [], []>} : vector<16x64xf32>, vector<64x128xf32>, vector<16x128xf32> -> vector<16x128xf32>
    %46 = arith.addf %41, %45 : vector<16x128xf32>
    %c9_48 = arith.constant 9 : index
    %c0_49 = arith.constant 0 : index
    %47 = vector.load %arg10[%c9_48, %c0_49] : memref<32x64xf32, #tpu.memory_space<vmem>>, vector<16x64xf32>
    %c2_50 = arith.constant 2 : index
    %c0_51 = arith.constant 0 : index
    %c0_52 = arith.constant 0 : index
    %48 = vector.load %arg5[%c2_50, %c0_51, %c0_52] : memref<3x64x128xf32, #tpu.memory_space<vmem>>, vector<1x64x128xf32>
    %49 = vector.shape_cast %48 : vector<1x64x128xf32> to vector<64x128xf32>
    %cst_53 = arith.constant dense<0.000000e+00> : vector<16x128xf32>
    %50 = tpu.matmul %47, %49, %cst_53 {dimension_numbers = #tpu.dot_dimension_numbers<[1], [0], [0], [1], [0, 0, 1, 1], [], []>} : vector<16x64xf32>, vector<64x128xf32>, vector<16x128xf32> -> vector<16x128xf32>
    %51 = arith.addf %46, %50 : vector<16x128xf32>
    %c0_54 = arith.constant 0 : index
    %c0_55 = arith.constant 0 : index
    %52 = vector.load %arg6[%c0_54, %c0_55] : memref<1x128xf32, #tpu.memory_space<vmem>>, vector<1x128xf32>
    %53 = vector.broadcast %52 : vector<1x128xf32> to vector<16x128xf32>
    %54 = arith.mulf %51, %53 : vector<16x128xf32>
    %c0_56 = arith.constant 0 : index
    %c0_57 = arith.constant 0 : index
    %55 = vector.load %arg7[%c0_56, %c0_57] : memref<1x128xf32, #tpu.memory_space<vmem>>, vector<1x128xf32>
    %56 = vector.broadcast %55 : vector<1x128xf32> to vector<16x128xf32>
    %57 = arith.addf %54, %56 : vector<16x128xf32>
    %cst_58 = arith.constant 0.000000e+00 : f32
    %58 = vector.broadcast %cst_58 : f32 to vector<16x128xf32>
    %59 = arith.maximumf %57, %58 : vector<16x128xf32>
    %c0_59 = arith.constant 0 : index
    %c0_60 = arith.constant 0 : index
    %c0_61 = arith.constant 0 : index
    %60 = vector.load %arg8[%c0_59, %c0_60, %c0_61] : memref<1x16x128xf32, #tpu.memory_space<vmem>>, vector<1x16x128xf32>
    %61 = vector.shape_cast %60 : vector<1x16x128xf32> to vector<16x128xf32>
    %62 = vector.shape_cast %59 : vector<16x128xf32> to vector<1x16x128xf32>
    tpu.vector_store %arg8[%c0_59, %c0_60, %c0_61], %62 {strides = array<i32>} : memref<1x16x128xf32, #tpu.memory_space<vmem>>, vector<1x16x128xf32>,
    return
  }
  func.func @transform_0(%arg0: i32) -> (i32, i32, i32) {
    %c0_i32 = arith.constant 0 : i32
    %c0_i32_0 = arith.constant 0 : i32
    %c0_i32_1 = arith.constant 0 : i32
    return %arg0, %c0_i32, %c0_i32_0 : i32, i32, i32
  }
  func.func @transform_1(%arg0: i32) -> (i32, i32, i32) {
    %c0_i32 = arith.constant 0 : i32
    %c0_i32_0 = arith.constant 0 : i32
    %c0_i32_1 = arith.constant 0 : i32
    %c0_i32_2 = arith.constant 0 : i32
    return %c0_i32, %c0_i32_0, %c0_i32_1 : i32, i32, i32
  }
  func.func @transform_2(%arg0: i32) -> (i32, i32) {
    %c0_i32 = arith.constant 0 : i32
    %c0_i32_0 = arith.constant 0 : i32
    %c0_i32_1 = arith.constant 0 : i32
    return %c0_i32, %c0_i32_0 : i32, i32
  }
  func.func @transform_3(%arg0: i32) -> (i32, i32) {
    %c0_i32 = arith.constant 0 : i32
    %c0_i32_0 = arith.constant 0 : i32
    %c0_i32_1 = arith.constant 0 : i32
    return %c0_i32, %c0_i32_0 : i32, i32
  }
  func.func @transform_4(%arg0: i32) -> (i32, i32, i32) {
    %c0_i32 = arith.constant 0 : i32
    %c0_i32_0 = arith.constant 0 : i32
    %c0_i32_1 = arith.constant 0 : i32
    %c0_i32_2 = arith.constant 0 : i32
    return %c0_i32, %c0_i32_0, %c0_i32_1 : i32, i32, i32
  }
  func.func @transform_5(%arg0: i32) -> (i32, i32) {
    %c0_i32 = arith.constant 0 : i32
    %c0_i32_0 = arith.constant 0 : i32
    %c0_i32_1 = arith.constant 0 : i32
    return %c0_i32, %c0_i32_0 : i32, i32
  }
  func.func @transform_6(%arg0: i32) -> (i32, i32) {
    %c0_i32 = arith.constant 0 : i32
    %c0_i32_0 = arith.constant 0 : i32
    %c0_i32_1 = arith.constant 0 : i32
    return %c0_i32, %c0_i32_0 : i32, i32
  }
  func.func @transform_7(%arg0: i32) -> (i32, i32, i32) {
    %c0_i32 = arith.constant 0 : i32
    %c0_i32_0 = arith.constant 0 : i32
    %c0_i32_1 = arith.constant 0 : i32
    return %arg0, %c0_i32, %c0_i32_0 : i32, i32, i32
  }
}

</mosaic_0001>

<bundles_post_ra>
// kernel: tile.23
= control target key start
LH: loop header
LB: loop body
LE: loop exit
PB: predicated region body
PF: predicated region fallthrough
CT: control target
= control target key end

     0   :  { %s28_s0 = inlined_call_operand.vmem [shape: f32[4], index: 0, kind: input, shape index: {}]   ;;  %s29_s1 = inlined_call_operand.vmem [shape: f32[16,4], index: 1, kind: output, shape index: {}]  }
   0x1   :  { %v4_v0 = vld [vmem:[%s28_s0] ss:$0 sm:$0xff] }
   0x2   :  { %5 = vst [vmem:[%s29_s1] sm:$0xff] %v4_v0  ;;  %8 = vst [vmem:[%s29_s1 + $0x8] sm:$0xff] %v4_v0 }

// kernel: tile.24
= control target key start
LH: loop header
LB: loop body
LE: loop exit
PB: predicated region body
PF: predicated region fallthrough
CT: control target
= control target key end

     0   :  { %s131_s10 = smov 60   ;;  %s132_s11 = smov 52   ;;  %vm3_vm0 = vcmask 31744   ;;  %vm9_vm1 = vcmask 523744   ;;  %vm15_vm2 = vcmask 490944   ;;  %vm21_vm3 = vcmask 458144   ;;  %s207_s0 = inlined_call_operand.vmem [shape: f32[16,4], index: 0, kind: input, shape index: {}]   ;;  %s208_s1 = inlined_call_operand.vmem [shape: f32[1,64], index: 1, kind: output, shape index: {}]  }
   0x1   :  { %v101_v0 = vld [vmem:[%s207_s0 + $0xf] sm:$0x1]   ;;  %v103_v1 = vld [vmem:[%s207_s0 + $0xd] sm:$0x1]   ;;  %v102_v2 = vld [vmem:[%s207_s0 + $0xe] sm:$0x1]  }
   0x2   :  { %7 = vrot.lane.b32.xlu0 %v101_v0, %s131_s10  ;;  %19 = vrot.lane.b32.xlu1 %v103_v1, %s132_s11  ;;  %v104_v3 = vld [vmem:[%s207_s0 + $0xc] sm:$0x1]   ;;  %s133_s16 = smov 56   ;;  %s134_s17 = smov 48   ;;  %v105_v4 = vld [vmem:[%s207_s0 + $0xb] sm:$0x1]  }
   0x3   :  { %v106_v5 = vld [vmem:[%s207_s0 + $0xa] sm:$0x1]   ;;  %v2_v6 = vld [vmem:[%s207_s0] sm:$0x1]   ;;  %s135_s24 = smov 44   ;;  %s136_s25 = smov 40  }
   0x4   :  { %4 = vst.msk [vmem:[#allocation0] sm:$0x1] %vm3_vm0, %v2_v6   ;;  %v107_v7 = vld [vmem:[%s207_s0 + $0x9] sm:$0x1]   ;;  %v108_v8 = vld [vmem:[%s207_s0 + $0x8] sm:$0x1]  }
   0x5   :  { %s137_s30 = smov 36   ;;  %s138_s2 = smov 32   ;;  %v109_v9 = vld [vmem:[%s207_s0 + $0x7] sm:$0x1]   ;;  %v110_v10 = vld [vmem:[%s207_s0 + $0x6] sm:$0x1]  }
   0x6   :  { %13 = vrot.lane.b32.xlu0 %v102_v2, %s133_s16  ;;  %25 = vrot.lane.b32.xlu1 %v104_v3, %s134_s17  ;;  %s139_s7 = smov 28   ;;  %s140_s8 = smov 24   ;;  %v111_v11 = vld [vmem:[%s207_s0 + $0x5] sm:$0x1]   ;;  %v112_v12 = vld [vmem:[%s207_s0 + $0x4] sm:$0x1]  }
   0x7   :  { %s141_s13 = smov 20   ;;  %s142_s14 = smov 16   ;;  %v113_v13 = vld [vmem:[%s207_s0 + $0x3] sm:$0x1]   ;;  %v114_v14 = vld [vmem:[%s207_s0 + $0x2] sm:$0x1]  }
   0x8   :  { %s143_s19 = smov 12   ;;  %s144_s20 = smov 8   ;;  %v115_v15 = vld [vmem:[%s207_s0 + $0x1] sm:$0x1]   ;;  %vm27_vm4 = vcmask 425344   ;;  %vm33_vm5 = vcmask 392544  }
   0x9   :  { %s145_s0 = smov 4   ;;  %vm39_vm6 = vcmask 359744   ;;  %vm45_vm7 = vcmask 326944   ;;  %vm51_vm8 = vcmask 294144   ;;  %vm57_vm9 = vcmask 261344  }
   0xa   :  { %31 = vrot.lane.b32.xlu0 %v105_v4, %s135_s24  ;;  %37 = vrot.lane.b32.xlu1 %v106_v5, %s136_s25  ;;  %vm63_vm10 = vcmask 228544   ;;  %vm69_vm11 = vcmask 195744   ;;  %vm75_vm12 = vcmask 162944   ;;  %vm81_vm13 = vcmask 130144  }
   0xb   :  { %vm87_vm14 = vcmask 97344   ;;  %vm93_vm15 = vcmask 64544  }
   0xe   :  { %43 = vrot.lane.b32.xlu0 %v107_v7, %s137_s30  ;;  %49 = vrot.lane.b32.xlu1 %v108_v8, %s138_s2 }
  0x12   :  { %55 = vrot.lane.b32.xlu0 %v109_v9, %s139_s7  ;;  %61 = vrot.lane.b32.xlu1 %v110_v10, %s140_s8 }
  0x16   :  { %67 = vrot.lane.b32.xlu0 %v111_v11, %s141_s13  ;;  %73 = vrot.lane.b32.xlu1 %v112_v12, %s142_s14 }
  0x1a   :  { %79 = vrot.lane.b32.xlu0 %v113_v13, %s143_s19  ;;  %85 = vrot.lane.b32.xlu1 %v114_v14, %s144_s20 }
  0x1e   :  { %91 = vrot.lane.b32.xlu0 %v115_v15, %s145_s0 }
  0x74   :  { %v8_v16 = vpop.permute.xlu0 %7   ;;  %v20_v17 = vpop.permute.xlu1 %19  }
  0x75   :  { %10 = vst.msk [vmem:[#allocation0] sm:$0x1] %vm9_vm1, %v8_v16  }
  0x78   :  { %v14_v18 = vpop.permute.xlu0 %13   ;;  %v26_v19 = vpop.permute.xlu1 %25  }
  0x79   :  { %16 = vst.msk [vmem:[#allocation0] sm:$0x1] %vm15_vm2, %v14_v18  }
  0x7a   :  { %22 = vst.msk [vmem:[#allocation0] sm:$0x1] %vm21_vm3, %v20_v17  }
  0x7b   :  { %28 = vst.msk [vmem:[#allocation0] sm:$0x1] %vm27_vm4, %v26_v19  }
  0x7c   :  { %v32_v20 = vpop.permute.xlu0 %31   ;;  %v38_v21 = vpop.permute.xlu1 %37  }
  0x7d   :  { %34 = vst.msk [vmem:[#allocation0] sm:$0x1] %vm33_vm5, %v32_v20  }
  0x7e   :  { %40 = vst.msk [vmem:[#allocation0] sm:$0x1] %vm39_vm6, %v38_v21  }
  0x80   :  { %v44_v22 = vpop.permute.xlu0 %43   ;;  %v50_v23 = vpop.permute.xlu1 %49  }
  0x81   :  { %46 = vst.msk [vmem:[#allocation0] sm:$0x1] %vm45_vm7, %v44_v22  }
  0x82   :  { %52 = vst.msk [vmem:[#allocation0] sm:$0x1] %vm51_vm8, %v50_v23  }
  0x84   :  { %v56_v24 = vpop.permute.xlu0 %55   ;;  %v62_v25 = vpop.permute.xlu1 %61  }
  0x85   :  { %58 = vst.msk [vmem:[#allocation0] sm:$0x1] %vm57_vm9, %v56_v24  }
  0x86   :  { %64 = vst.msk [vmem:[#allocation0] sm:$0x1] %vm63_vm10, %v62_v25  }
  0x88   :  { %v68_v26 = vpop.permute.xlu0 %67   ;;  %v74_v27 = vpop.permute.xlu1 %73  }
  0x89   :  { %70 = vst.msk [vmem:[#allocation0] sm:$0x1] %vm69_vm11, %v68_v26  }
  0x8a   :  { %76 = vst.msk [vmem:[#allocation0] sm:$0x1] %vm75_vm12, %v74_v27  }
  0x8c   :  { %v80_v28 = vpop.permute.xlu0 %79   ;;  %v86_v29 = vpop.permute.xlu1 %85  }
  0x8d   :  { %82 = vst.msk [vmem:[#allocation0] sm:$0x1] %vm81_vm13, %v80_v28  }
  0x8e   :  { %88 = vst.msk [vmem:[#allocation0] sm:$0x1] %vm87_vm14, %v86_v29  }
  0x90   :  { %v92_v30 = vpop.permute.xlu0 %91  }
  0x91   :  { %94 = vst.msk [vmem:[#allocation0] sm:$0x1] %vm93_vm15, %v92_v30  }
  0x98   :  { %v98_v31 = vld [vmem:[#allocation0] sm:$0x1] }
  0x99   :  { %100 = vst [vmem:[%s208_s1] sm:$0x1] %v98_v31 }

// kernel: tile.33
= control target key start
LH: loop header
LB: loop body
LE: loop exit
PB: predicated region body
PF: predicated region fallthrough
CT: control target
= control target key end

     0   :  { %s28_s0 = inlined_call_operand.vmem [shape: f32[8], index: 0, kind: input, shape index: {}]   ;;  %s29_s1 = inlined_call_operand.vmem [shape: f32[16,8], index: 1, kind: output, shape index: {}]  }
   0x1   :  { %v4_v0 = vld [vmem:[%s28_s0] ss:$0 sm:$0xff] }
   0x2   :  { %5 = vst [vmem:[%s29_s1] sm:$0xff] %v4_v0  ;;  %8 = vst [vmem:[%s29_s1 + $0x8] sm:$0xff] %v4_v0 }

// kernel: tile.34
= control target key start
LH: loop header
LB: loop body
LE: loop exit
PB: predicated region body
PF: predicated region fallthrough
CT: control target
= control target key end

     0   :  { %s131_s10 = smov 120   ;;  %s132_s11 = smov 104   ;;  %vm3_vm0 = vcmask 64512   ;;  %vm9_vm1 = vcmask 1048512   ;;  %vm15_vm2 = vcmask 982912   ;;  %vm21_vm3 = vcmask 917312   ;;  %s207_s0 = inlined_call_operand.vmem [shape: f32[16,8], index: 0, kind: input, shape index: {}]   ;;  %s208_s1 = inlined_call_operand.vmem [shape: f32[1,128], index: 1, kind: output, shape index: {}]  }
   0x1   :  { %v101_v0 = vld [vmem:[%s207_s0 + $0xf] sm:$0x1]   ;;  %v103_v1 = vld [vmem:[%s207_s0 + $0xd] sm:$0x1]   ;;  %v102_v2 = vld [vmem:[%s207_s0 + $0xe] sm:$0x1]  }
   0x2   :  { %7 = vrot.lane.b32.xlu0 %v101_v0, %s131_s10  ;;  %19 = vrot.lane.b32.xlu1 %v103_v1, %s132_s11  ;;  %v104_v3 = vld [vmem:[%s207_s0 + $0xc] sm:$0x1]   ;;  %s133_s16 = smov 112   ;;  %s134_s17 = smov 96   ;;  %v105_v4 = vld [vmem:[%s207_s0 + $0xb] sm:$0x1]  }
   0x3   :  { %v106_v5 = vld [vmem:[%s207_s0 + $0xa] sm:$0x1]   ;;  %v2_v6 = vld [vmem:[%s207_s0] sm:$0x1]   ;;  %s135_s24 = smov 88   ;;  %s136_s25 = smov 80  }
   0x4   :  { %4 = vst.msk [vmem:[#allocation0] sm:$0x1] %vm3_vm0, %v2_v6   ;;  %v107_v7 = vld [vmem:[%s207_s0 + $0x9] sm:$0x1]   ;;  %v108_v8 = vld [vmem:[%s207_s0 + $0x8] sm:$0x1]  }
   0x5   :  { %s137_s30 = smov 72   ;;  %s138_s2 = smov 64   ;;  %v109_v9 = vld [vmem:[%s207_s0 + $0x7] sm:$0x1]   ;;  %v110_v10 = vld [vmem:[%s207_s0 + $0x6] sm:$0x1]  }
   0x6   :  { %13 = vrot.lane.b32.xlu0 %v102_v2, %s133_s16  ;;  %25 = vrot.lane.b32.xlu1 %v104_v3, %s134_s17  ;;  %s139_s7 = smov 56   ;;  %s140_s8 = smov 48   ;;  %v111_v11 = vld [vmem:[%s207_s0 + $0x5] sm:$0x1]   ;;  %v112_v12 = vld [vmem:[%s207_s0 + $0x4] sm:$0x1]  }
   0x7   :  { %s141_s13 = smov 40   ;;  %s142_s14 = smov 32   ;;  %v113_v13 = vld [vmem:[%s207_s0 + $0x3] sm:$0x1]   ;;  %v114_v14 = vld [vmem:[%s207_s0 + $0x2] sm:$0x1]  }
   0x8   :  { %s143_s19 = smov 24   ;;  %s144_s20 = smov 16   ;;  %v115_v15 = vld [vmem:[%s207_s0 + $0x1] sm:$0x1]   ;;  %vm27_vm4 = vcmask 851712   ;;  %vm33_vm5 = vcmask 786112  }
   0x9   :  { %s145_s0 = smov 8   ;;  %vm39_vm6 = vcmask 720512   ;;  %vm45_vm7 = vcmask 654912   ;;  %vm51_vm8 = vcmask 589312   ;;  %vm57_vm9 = vcmask 523712  }
   0xa   :  { %31 = vrot.lane.b32.xlu0 %v105_v4, %s135_s24  ;;  %37 = vrot.lane.b32.xlu1 %v106_v5, %s136_s25  ;;  %vm63_vm10 = vcmask 458112   ;;  %vm69_vm11 = vcmask 392512   ;;  %vm75_vm12 = vcmask 326912   ;;  %vm81_vm13 = vcmask 261312  }
   0xb   :  { %vm87_vm14 = vcmask 195712   ;;  %vm93_vm15 = vcmask 130112  }
   0xe   :  { %43 = vrot.lane.b32.xlu0 %v107_v7, %s137_s30  ;;  %49 = vrot.lane.b32.xlu1 %v108_v8, %s138_s2 }
  0x12   :  { %55 = vrot.lane.b32.xlu0 %v109_v9, %s139_s7  ;;  %61 = vrot.lane.b32.xlu1 %v110_v10, %s140_s8 }
  0x16   :  { %67 = vrot.lane.b32.xlu0 %v111_v11, %s141_s13  ;;  %73 = vrot.lane.b32.xlu1 %v112_v12, %s142_s14 }
  0x1a   :  { %79 = vrot.lane.b32.xlu0 %v113_v13, %s143_s19  ;;  %85 = vrot.lane.b32.xlu1 %v114_v14, %s144_s20 }
  0x1e   :  { %91 = vrot.lane.b32.xlu0 %v115_v15, %s145_s0 }
  0x74   :  { %v8_v16 = vpop.permute.xlu0 %7   ;;  %v20_v17 = vpop.permute.xlu1 %19  }
  0x75   :  { %10 = vst.msk [vmem:[#allocation0] sm:$0x1] %vm9_vm1, %v8_v16  }
  0x78   :  { %v14_v18 = vpop.permute.xlu0 %13   ;;  %v26_v19 = vpop.permute.xlu1 %25  }
  0x79   :  { %16 = vst.msk [vmem:[#allocation0] sm:$0x1] %vm15_vm2, %v14_v18  }
  0x7a   :  { %22 = vst.msk [vmem:[#allocation0] sm:$0x1] %vm21_vm3, %v20_v17  }
  0x7b   :  { %28 = vst.msk [vmem:[#allocation0] sm:$0x1] %vm27_vm4, %v26_v19  }
  0x7c   :  { %v32_v20 = vpop.permute.xlu0 %31   ;;  %v38_v21 = vpop.permute.xlu1 %37  }
  0x7d   :  { %34 = vst.msk [vmem:[#allocation0] sm:$0x1] %vm33_vm5, %v32_v20  }
  0x7e   :  { %40 = vst.msk [vmem:[#allocation0] sm:$0x1] %vm39_vm6, %v38_v21  }
  0x80   :  { %v44_v22 = vpop.permute.xlu0 %43   ;;  %v50_v23 = vpop.permute.xlu1 %49  }
  0x81   :  { %46 = vst.msk [vmem:[#allocation0] sm:$0x1] %vm45_vm7, %v44_v22  }
  0x82   :  { %52 = vst.msk [vmem:[#allocation0] sm:$0x1] %vm51_vm8, %v50_v23  }
  0x84   :  { %v56_v24 = vpop.permute.xlu0 %55   ;;  %v62_v25 = vpop.permute.xlu1 %61  }
  0x85   :  { %58 = vst.msk [vmem:[#allocation0] sm:$0x1] %vm57_vm9, %v56_v24  }
  0x86   :  { %64 = vst.msk [vmem:[#allocation0] sm:$0x1] %vm63_vm10, %v62_v25  }
  0x88   :  { %v68_v26 = vpop.permute.xlu0 %67   ;;  %v74_v27 = vpop.permute.xlu1 %73  }
  0x89   :  { %70 = vst.msk [vmem:[#allocation0] sm:$0x1] %vm69_vm11, %v68_v26  }
  0x8a   :  { %76 = vst.msk [vmem:[#allocation0] sm:$0x1] %vm75_vm12, %v74_v27  }
  0x8c   :  { %v80_v28 = vpop.permute.xlu0 %79   ;;  %v86_v29 = vpop.permute.xlu1 %85  }
  0x8d   :  { %82 = vst.msk [vmem:[#allocation0] sm:$0x1] %vm81_vm13, %v80_v28  }
  0x8e   :  { %88 = vst.msk [vmem:[#allocation0] sm:$0x1] %vm87_vm14, %v86_v29  }
  0x90   :  { %v92_v30 = vpop.permute.xlu0 %91  }
  0x91   :  { %94 = vst.msk [vmem:[#allocation0] sm:$0x1] %vm93_vm15, %v92_v30  }
  0x98   :  { %v98_v31 = vld [vmem:[#allocation0] sm:$0x1] }
  0x99   :  { %100 = vst [vmem:[%s208_s1] sm:$0x1] %v98_v31 }

// kernel: block_type_b_forward.1
= control target key start
LH: loop header
LB: loop body
LE: loop exit
PB: predicated region body
PF: predicated region fallthrough
CT: control target
= control target key end

     0   :  { %s1342_s24 = smov 0   ;;  %s1550_s0 = inlined_call_operand.vmem [shape: f32[2,16,64], index: 0, kind: input, shape index: {}]   ;;  %s1551_s1 = inlined_call_operand.vmem [shape: f32[3,64,64], index: 1, kind: input, shape index: {}]   ;;  %s1552_s2 = inlined_call_operand.vmem [shape: f32[1,64], index: 2, kind: input, shape index: {}]   ;;  %s1553_s3 = inlined_call_operand.vmem [shape: f32[1,64], index: 3, kind: input, shape index: {}]   ;;  %s1554_s4 = inlined_call_operand.vmem [shape: f32[3,64,128], index: 4, kind: input, shape index: {}]   ;;  %s1555_s5 = inlined_call_operand.vmem [shape: f32[1,128], index: 5, kind: input, shape index: {}]   ;;  %s1556_s6 = inlined_call_operand.vmem [shape: f32[1,128], index: 6, kind: input, shape index: {}]   ;;  %s1557_s7 = inlined_call_operand.vmem [shape: f32[2,16,128], index: 7, kind: output, shape index: {}]  }
   0x1 LB: > { %s945_s25 = sadd.s32 4294967295, %s1299_s24   ;;  %p949_p0 = scmp.ge.s32.totalorder %s1299_s24, 1  ;;  %s1299_s24 = sphi %s1342_s24, %s17_s24  }
   0x2   : > { %p237_p1 = scmp.lt.s32.totalorder %s1299_s24, 3 }
   0x4   : > { %p238_p2 = pnand %p949_p0, %p237_p1 }
   0x5   : > { %v954_v0 = vld [vmem:[%s1551_s1 + $0x40] sm:$0xff] (!%p238_p2)  ;;  %v955_v1 = vld [vmem:[%s1551_s1 + $0x48] sm:$0xff] (!%p238_p2)  ;;  %v956_v2 = vld [vmem:[%s1551_s1 + $0x50] sm:$0xff] (!%p238_p2)  ;;  %p269_p3 = scmp.lt.s32.totalorder (!%p238_p2), %s945_s25, 1  ;;  %vm279_vm0 = vcmask (!%p238_p2), 523264   ;;  %v1301_v5 = vmov (!%p238_p2), 0.0  }
   0x6   : > { %241 = sbr.rel (%p238_p2) target bundleno = 540 (0x21c), region = 48  ;;  %v1180_v3 = vpack.c.bf16 (!%p238_p2), %v955_v1, %v954_v0  ;;  %v957_v4 = vld [vmem:[%s1551_s1 + $0x58] sm:$0xff] (!%p238_p2)  ;;  %280 = vst.msk [vmem:[#allocation2] sm:$0xff] (!%p238_p2), %vm279_vm0, %v1301_v5  ;;  %281 = vst.msk [vmem:[#allocation2 + $0x18] sm:$0xff] (!%p238_p2), %vm279_vm0, %v1301_v5  ;;  %v958_v7 = vld [vmem:[%s1551_s1 + $0x60] sm:$0xff] (!%p238_p2) }
   0x7   : > { %587 = vst.msk [vmem:[#allocation3] sm:$0xff] (!%p238_p2), %vm279_vm0, %v1301_v5  ;;  %588 = vst.msk [vmem:[#allocation3 + $0x18] sm:$0xff] (!%p238_p2), %vm279_vm0, %v1301_v5  ;;  %v1184_v6 = vpack.c.bf16 (!%p238_p2), %v957_v4, %v956_v2  ;;  %v959_v8 = vld [vmem:[%s1551_s1 + $0x68] sm:$0xff] (!%p238_p2)  ;;  %v960_v10 = vld [vmem:[%s1551_s1 + $0x70] sm:$0xff] (!%p238_p2) }
   0x8   : > { %1181 = vmatprep.subr.bf16.mxu0 (!%p238_p2), %v1180_v3  ;;  %v1188_v9 = vpack.c.bf16 (!%p238_p2), %v959_v8, %v958_v7  ;;  %v961_v11 = vld [vmem:[%s1551_s1 + $0x78] sm:$0xff] (!%p238_p2)  ;;  %v288_v15 = vld [vmem:[%s1551_s1] sm:$0xff] (!%p238_p2)  ;;  %v289_v16 = vld [vmem:[%s1551_s1 + $0x8] sm:$0xff] (!%p238_p2) }
   0x9   : > { %1183 = vmatpush3.bf16.msra.mxu0 (!%p238_p2), %v1180_v3  ;;  %v1192_v14 = vpack.c.bf16 (!%p238_p2), %v961_v11, %v960_v10  ;;  %v1196_v17 = vpack.c.bf16 (!%p238_p2), %v289_v16, %v288_v15  ;;  %v290_v19 = vld [vmem:[%s1551_s1 + $0x10] sm:$0xff] (!%p238_p2)  ;;  %v291_v20 = vld [vmem:[%s1551_s1 + $0x18] sm:$0xff] (!%p238_p2)  ;;  %v292_v24 = vld [vmem:[%s1551_s1 + $0x20] sm:$0xff] (!%p238_p2) }
   0xa   : > { %1185 = vmatprep.subr.bf16.mxu0 (!%p238_p2), %v1184_v6  ;;  %v1200_v22 = vpack.c.bf16 (!%p238_p2), %v291_v20, %v290_v19  ;;  %v293_v25 = vld [vmem:[%s1551_s1 + $0x28] sm:$0xff] (!%p238_p2)  ;;  %v294_v27 = vld [vmem:[%s1551_s1 + $0x30] sm:$0xff] (!%p238_p2)  ;;  %v295_v28 = vld [vmem:[%s1551_s1 + $0x38] sm:$0xff] (!%p238_p2) }
   0xb   : > { %v1204_v26 = vpack.c.bf16 (!%p238_p2), %v293_v25, %v292_v24  ;;  %v1208_v29 = vpack.c.bf16 (!%p238_p2), %v295_v28, %v294_v27  ;;  %v966_v30 = vld [vmem:[%s1551_s1 + $0x80] sm:$0xff] (!%p238_p2)  ;;  %v967_v31 = vld [vmem:[%s1551_s1 + $0x88] sm:$0xff] (!%p238_p2)  ;;  %v968_v33 = vld [vmem:[%s1551_s1 + $0x90] sm:$0xff] (!%p238_p2) }
   0xc   : > { %v1212_v32 = vpack.c.bf16 (!%p238_p2), %v967_v31, %v966_v30  ;;  %v969_v34 = vld [vmem:[%s1551_s1 + $0x98] sm:$0xff] (!%p238_p2)  ;;  %v970_v38 = vld [vmem:[%s1551_s1 + $0xa0] sm:$0xff] (!%p238_p2)  ;;  %v971_v39 = vld [vmem:[%s1551_s1 + $0xa8] sm:$0xff] (!%p238_p2) }
   0xd   : > { %s1559_s25 = smov (!%p269_p3, %s945_s25), 1  ;;  %1187 = vmatpush3.bf16.msra.mxu0 %v1184_v6  ;;  %v1216_v36 = vpack.c.bf16 %v969_v34, %v968_v33  ;;  %v1220_v40 = vpack.c.bf16 %v971_v39, %v970_v38  ;;  %v972_v41 = vld [vmem:[%s1551_s1 + $0xb0] sm:$0xff]  ;;  %v973_v42 = vld [vmem:[%s1551_s1 + $0xb8] sm:$0xff]  ;;  %v978_v45 = vld [vmem:[%s1554_s4 + $0x40] sm:$0xff] }
   0xe   : > { %s1004_s15 = sshll.u32 %s1559_s25, 4  ;;  %1189 = vmatprep.subr.bf16.mxu0 %v1188_v9  ;;  %v1224_v43 = vpack.c.bf16 %v973_v42, %v972_v41  ;;  %v979_v46 = vld [vmem:[%s1554_s4 + $0x48] sm:$0xff]  ;;  %v980_v48 = vld [vmem:[%s1554_s4 + $0x50] sm:$0xff]  ;;  %v981_v49 = vld [vmem:[%s1554_s4 + $0x58] sm:$0xff] }
   0xf   : > { %s273_s20 = scalar_lea.vmem %s1550_s0, %s1004_s15  ;;  %v1228_v47 = vpack.c.bf16 %v979_v46, %v978_v45  ;;  %v1232_v50 = vpack.c.bf16 %v981_v49, %v980_v48  ;;  %v982_v51 = vld [vmem:[%s1554_s4 + $0x60] sm:$0xff]  ;;  %v983_v52 = vld [vmem:[%s1554_s4 + $0x68] sm:$0xff]  ;;  %v984_v54 = vld [vmem:[%s1554_s4 + $0x70] sm:$0xff]  ;;  %s278_s12 = scalar_lea.vmem %s1557_s7, %s1004_s15 }
  0x10   : > { %v1386_v12 = vld [vmem:[%s273_s20] sm:$0xff]  ;;  %v1388_v13 = vld [vmem:[%s273_s20 + $0x8] sm:$0xff]  ;;  %v1236_v53 = vpack.c.bf16 %v983_v52, %v982_v51  ;;  %v985_v55 = vld [vmem:[%s1554_s4 + $0x78] sm:$0xff] }
  0x11   : > { %284 = vst.msk [vmem:[#allocation2 + $0x8] sm:$0xff] %vm279_vm0, %v1386_v12  ;;  %285 = vst.msk [vmem:[#allocation2 + $0x10] sm:$0xff] %vm279_vm0, %v1388_v13  ;;  %1191 = vmatpush3.bf16.msra.mxu0 %v1188_v9  ;;  %1229 = vmatprep.subr.bf16.mxu1 %v1228_v47  ;;  %v1240_v56 = vpack.c.bf16 %v985_v55, %v984_v54  ;;  %v593_v57 = vld [vmem:[%s1554_s4] sm:$0xff]  ;;  %v594_v58 = vld [vmem:[%s1554_s4 + $0x8] sm:$0xff] }
  0x12   : > { %1193 = vmatprep.subr.bf16.mxu0 %v1192_v14  ;;  %1231 = vmatpush3.bf16.msra.mxu1 %v1228_v47  ;;  %v1244_v59 = vpack.c.bf16 %v594_v58, %v593_v57  ;;  %v976_v60 = vld [vmem:[%s1552_s2] ss:$0 sm:$0xff]  ;;  %v595_v8 = vld [vmem:[%s1554_s4 + $0x10] sm:$0xff]  ;;  %v596_v9 = vld [vmem:[%s1554_s4 + $0x18] sm:$0xff] }
  0x13   : > { %1233 = vmatprep.subr.bf16.mxu1 %v1232_v50  ;;  %v977_v62 = vld [vmem:[%s1553_s3] ss:$0 sm:$0xff]  ;;  %v1248_v11 = vpack.c.bf16 %v596_v9, %v595_v8  ;;  %v993_v24 = vld [vmem:[%s1554_s4 + $0x98] sm:$0xff]  ;;  %v995_v28 = vld [vmem:[%s1554_s4 + $0xa8] sm:$0xff] }
  0x14   : > { %v990_v20 = vld [vmem:[%s1554_s4 + $0x80] sm:$0xff]  ;;  %v996_v31 = vld [vmem:[%s1554_s4 + $0xb0] sm:$0xff] }
  0x15   : > { %1195 = vmatpush3.bf16.msra.mxu0 %v1192_v14  ;;  %v994_v27 = vld [vmem:[%s1554_s4 + $0xa0] sm:$0xff] }
  0x16   : > { %1197 = vmatprep.subr.bf16.mxu0 %v1196_v17  ;;  %1235 = vmatpush3.bf16.msra.mxu1 %v1232_v50  ;;  %v1268_v30 = vpack.c.bf16 %v995_v28, %v994_v27 }
  0x17   : > { %1237 = vmatprep.subr.bf16.mxu1 %v1236_v53 }
  0x18   : > { %v296_v18 = vld [vmem:[#allocation2 + $0x8] sm:$0xff]  ;;  %v297_v21 = vld [vmem:[#allocation2 + $0x10] sm:$0xff] }
  0x19   : > { %1082 = vmatprep.mubr.msk.f32.mxu0 %vm279_vm0, %v296_v18  ;;  %v286_v23 = vld [vmem:[#allocation2 + $0x7] sm:$0xff]  ;;  %v287_v35 = vld [vmem:[#allocation2 + $0xf] sm:$0xff]  ;;  %v600_v18 = vld [vmem:[%s1554_s4 + $0x38] sm:$0xff] }
  0x1a   : > { %1083 = vmatmul.mubr.msk.f32.vlgmr.msra.gmra.mrb[0].mxu0 %vm279_vm0, %v297_v21  ;;  %v469_v37 = vld [vmem:[#allocation2 + $0x9] sm:$0xff]  ;;  %v470_v44 = vld [vmem:[#allocation2 + $0x11] sm:$0xff]  ;;  %1239 = vmatpush3.bf16.msra.mxu1 %v1236_v53 }
  0x1b   : > { %1199 = vmatpush3.bf16.msra.mxu0 %v1196_v17  ;;  %1101 = vmatprep.mubr.msk.f32.mxu0 %vm279_vm0, %v286_v23  ;;  %v599_v17 = vld [vmem:[%s1554_s4 + $0x30] sm:$0xff]  ;;  %v991_v21 = vld [vmem:[%s1554_s4 + $0x88] sm:$0xff] }
  0x1c   : > { %1201 = vmatprep.subr.bf16.mxu0 %v1200_v22  ;;  %1241 = vmatprep.subr.bf16.mxu1 %v1240_v56  ;;  %v1256_v19 = vpack.c.bf16 %v600_v18, %v599_v17  ;;  %v992_v23 = vld [vmem:[%s1554_s4 + $0x90] sm:$0xff] }
  0x1d   : > { %v1264_v25 = vpack.c.bf16 %v993_v24, %v992_v23 }
  0x1e   : > { %1243 = vmatpush3.bf16.msra.mxu1 %v1240_v56 }
  0x1f   : > { %1203 = vmatpush3.bf16.msra.mxu0 %v1200_v22  ;;  %1245 = vmatprep.subr.bf16.mxu1 %v1244_v59  ;;  %v1260_v22 = vpack.c.bf16 %v991_v21, %v990_v20 }
  0x20   : > { %1205 = vmatprep.subr.bf16.mxu0 %v1204_v26 }
  0x23   : > { %1207 = vmatpush3.bf16.msra.mxu0 %v1204_v26 }
  0x24   : > { %1209 = vmatprep.subr.bf16.mxu0 %v1208_v29 }
  0x27   : > { %1211 = vmatpush3.bf16.msra.mxu0 %v1208_v29 }
  0x28   : > { %1213 = vmatprep.subr.bf16.mxu0 %v1212_v32 }
  0x2a   : > { %1102 = vmatmul.mubr.msk.f32.vlgmr.msra.gmra.mrb[0].mxu0 %vm279_vm0, %v287_v35  ;;  %v1000_v35 = vld [vmem:[%s1555_s5] ss:$0 sm:$0xff] }
  0x2b   : > { %1215 = vmatpush3.bf16.msra.mxu0 %v1212_v32  ;;  %1120 = vmatprep.mubr.msk.f32.mxu0 %vm279_vm0, %v469_v37  ;;  %v997_v32 = vld [vmem:[%s1554_s4 + $0xb8] sm:$0xff]  ;;  %v1001_v37 = vld [vmem:[%s1556_s6] ss:$0 sm:$0xff] }
  0x2c   : > { %1217 = vmatprep.subr.bf16.mxu0 %v1216_v36  ;;  %v1272_v33 = vpack.c.bf16 %v997_v32, %v996_v31 }
  0x2f   : > { %1219 = vmatpush3.bf16.msra.mxu0 %v1216_v36 }
  0x30   : > { %1221 = vmatprep.subr.bf16.mxu0 %v1220_v40 }
  0x33   : > { %1223 = vmatpush3.bf16.msra.mxu0 %v1220_v40 }
  0x34   : > { %1225 = vmatprep.subr.bf16.mxu0 %v1224_v43 }
  0x37   : > { %1227 = vmatpush3.bf16.msra.mxu0 %v1224_v43 }
  0x3a   : > { %1121 = vmatmul.mubr.msk.f32.vlgmr.msra.gmra.mrb[0].mxu0 %vm279_vm0, %v470_v44 }
 0x10d   : > { %v1122_v61 = vpop.f32.mrb[0].mxu0 }
 0x10e   : > { %v571_v63 = vmul.f32 %v1122_v61, %v976_v60  ;;  %v552_v0 = vpop.f32.mrb[1].mxu0 }
 0x10f   : > { %v570_v1 = vmul.f32 %v976_v60, %v552_v0 }
 0x110   : > { %v580_v2 = vadd.f32 %v977_v62, %v571_v63 }
 0x111   : > { %v579_v3 = vadd.f32 %v977_v62, %v570_v1 }
 0x112   : > { %v582_v4 = vmax.f32 %v580_v2, 0.0 }
 0x113   : > { %v581_v5 = vmax.f32 %v579_v3, 0.0 }
 0x114   : > { %v586_v6 = vadd.f32 %v582_v4, %v1388_v13  ;;  %v598_v13 = vld [vmem:[%s1554_s4 + $0x28] sm:$0xff] }
 0x115   : > { %v585_v7 = vadd.f32 %v581_v5, %v1386_v12  ;;  %v597_v12 = vld [vmem:[%s1554_s4 + $0x20] sm:$0xff] }
 0x116   : > { %590 = vst.msk [vmem:[#allocation3 + $0x10] sm:$0xff] %vm279_vm0, %v586_v6  ;;  %v1252_v16 = vpack.c.bf16 %v598_v13, %v597_v12 }
 0x117   : > { %589 = vst.msk [vmem:[#allocation3 + $0x8] sm:$0xff] %vm279_vm0, %v585_v7 }
 0x11d   : > { %v602_v14 = vld [vmem:[#allocation3 + $0x10] sm:$0xff] }
 0x11e   : > { %v601_v10 = vld [vmem:[#allocation3 + $0x8] sm:$0xff]  ;;  %v775_v34 = vld [vmem:[#allocation3 + $0x11] sm:$0xff] }
 0x11f   : > { %1139 = vmatprep.mubr.msk.f32.mxu1 %vm279_vm0, %v601_v10  ;;  %v591_v15 = vld [vmem:[#allocation3 + $0x7] sm:$0xff]  ;;  %v592_v26 = vld [vmem:[#allocation3 + $0xf] sm:$0xff] }
 0x120   : > { %1140 = vmatmul.mubr.msk.f32.vlgmr.msra.gmra.mrb[0].mxu1 %vm279_vm0, %v602_v14  ;;  %v774_v29 = vld [vmem:[#allocation3 + $0x9] sm:$0xff] }
 0x121   : > { %1247 = vmatpush3.bf16.msra.mxu1 %v1244_v59  ;;  %1158 = vmatprep.mubr.msk.f32.mxu1 %vm279_vm0, %v591_v15 }
 0x122   : > { %1249 = vmatprep.subr.bf16.mxu1 %v1248_v11 }
 0x125   : > { %1251 = vmatpush3.bf16.msra.mxu1 %v1248_v11 }
 0x126   : > { %1253 = vmatprep.subr.bf16.mxu1 %v1252_v16 }
 0x129   : > { %1255 = vmatpush3.bf16.msra.mxu1 %v1252_v16 }
 0x12a   : > { %1257 = vmatprep.subr.bf16.mxu1 %v1256_v19 }
 0x12d   : > { %1259 = vmatpush3.bf16.msra.mxu1 %v1256_v19 }
 0x12e   : > { %1261 = vmatprep.subr.bf16.mxu1 %v1260_v22 }
 0x130   : > { %1159 = vmatmul.mubr.msk.f32.vlgmr.msra.gmra.mrb[0].mxu1 %vm279_vm0, %v592_v26 }
 0x131   : > { %1263 = vmatpush3.bf16.msra.mxu1 %v1260_v22  ;;  %1177 = vmatprep.mubr.msk.f32.mxu1 %vm279_vm0, %v774_v29 }
 0x132   : > { %1265 = vmatprep.subr.bf16.mxu1 %v1264_v25 }
 0x135   : > { %1267 = vmatpush3.bf16.msra.mxu1 %v1264_v25 }
 0x136   : > { %1269 = vmatprep.subr.bf16.mxu1 %v1268_v30 }
 0x139   : > { %1271 = vmatpush3.bf16.msra.mxu1 %v1268_v30 }
 0x13a   : > { %1273 = vmatprep.subr.bf16.mxu1 %v1272_v33 }
 0x13d   : > { %1275 = vmatpush3.bf16.msra.mxu1 %v1272_v33 }
 0x140   : > { %1178 = vmatmul.mubr.msk.f32.vlgmr.msra.gmra.mrb[0].mxu1 %vm279_vm0, %v775_v34 }
 0x213   : > { %v1179_v36 = vpop.f32.mrb[0].mxu1 }
 0x214   : > { %v876_v38 = vmul.f32 %v1179_v36, %v1000_v35  ;;  %v857_v39 = vpop.f32.mrb[1].mxu1 }
 0x215   : > { %v875_v40 = vmul.f32 %v1000_v35, %v857_v39 }
 0x216   : > { %v885_v41 = vadd.f32 %v1001_v37, %v876_v38 }
 0x217   : > { %v884_v42 = vadd.f32 %v1001_v37, %v875_v40 }
 0x218   : > { %v887_v43 = vmax.f32 %v885_v41, 0.0 }
 0x219   : > { %v886_v44 = vmax.f32 %v884_v42, 0.0 }
 0x21a   : > { %889 = vst [vmem:[%s278_s12 + $0x8] sm:$0xff] %v887_v43 }
 0x21b   : > { %888 = vst [vmem:[%s278_s12] sm:$0xff] %v886_v44 }
 0x21c PF: > { %s17_s24 = sadd.s32 1, %s1299_s24  }
 0x21d   : > { %p14_p4 = scmp.ge.s32.totalorder %s17_s24, 4  }
 0x21f   :  { %16 = sbr.rel (!%p14_p4) target bundleno = 1 (0x1), region = 82 }

</bundles_post_ra>
